<compile_context>
chip_gen: v5e
topology: v5e:2x2
jax: 0.10.0
libtpu: 0.0.40
codegen_flags: <defaults>
</compile_context>

<pallas_src>
import math

import jax
import jax.numpy as jnp
from jax import lax
from jax.experimental import pallas as pl
from jax.experimental.pallas import tpu as pltpu

LANE = 128  # TPU vreg lane width; q/k/v blocks are padded to this so slices and stores are lane-aligned.


# -----------------------------------------------------------------------------
# Kernels
# -----------------------------------------------------------------------------
def _fused_causal_attn_kernel(x_ref, w_ref, b_ref, bias_ref, o_ref):
    """Collapsed form: whole (B*T, E) problem in one invocation (no grid).

    x_ref:    (N, E)        activations, N = B*T
    w_ref:    (E, 3*LANE)   fused [q|k|v] weights, each block lane-padded to 128 cols,
                            pre-transposed, SDPA scale folded into the q block.
    b_ref:    (1, 3*LANE)   fused bias (same packing).
    bias_ref: (N, N)        additive mask: 0 where attending, -1e30 elsewhere
                            (block-diagonal causal -> causality AND batch isolation).
    o_ref:    (N, LANE)     lane-dense output slab; first head_size columns are the result.
    """
    x = x_ref[...]

    # Single fused QKV projection on the MXU (one matmul, one bias add).
    qkv = jnp.dot(x, w_ref[...], preferred_element_type=jnp.float32) + b_ref[...]
    # Slices are vreg-aligned (offsets 0 / 128 / 256, width 128): no cross-lane relayout.
    q = qkv[:, :LANE]                 # query, already scaled by 1/sqrt(head_size)
    k = qkv[:, LANE:2 * LANE]
    v = qkv[:, 2 * LANE:]

    # Scores: contract q and k on the (lane-padded) head axis -> (N, N); padded columns
    # are exactly zero in both operands, so they contribute nothing.
    s = lax.dot_general(q, k, (((1,), (1,)), ((), ())),
                        preferred_element_type=jnp.float32)
    s = s + bias_ref[...]             # host-precomputed block-diagonal causal bias

    # Numerically stable softmax, fp32 on the VPU/EUP path, exact reciprocal (1e-5 gate).
    s = s - jnp.max(s, axis=-1, keepdims=True)
    p = jnp.exp(s)
    p = p * pl.reciprocal(jnp.sum(p, axis=-1, keepdims=True), approx=False)

    # Attention output back on the MXU; (N, LANE) store is a full-width unmasked vst.
    o_ref[...] = jnp.dot(p, v, preferred_element_type=jnp.float32).astype(o_ref.dtype)


def _per_batch_causal_attn_kernel(x_ref, w_ref, b_ref, bias_ref, o_ref):
    """Batch-parallel form (grid=(B,), "parallel"): one batch element per grid step so
    both v7x TensorCores get work. Same math as the collapsed kernel with per-batch blocks."""
    x = x_ref[0]                                                     # (T, E)
    qkv = jnp.dot(x, w_ref[...], preferred_element_type=jnp.float32) + b_ref[...]
    q = qkv[:, :LANE]
    k = qkv[:, LANE:2 * LANE]
    v = qkv[:, 2 * LANE:]
    s = lax.dot_general(q, k, (((1,), (1,)), ((), ())),
                        preferred_element_type=jnp.float32)          # (T, T)
    s = s + bias_ref[...]                                            # plain causal bias
    s = s - jnp.max(s, axis=-1, keepdims=True)
    p = jnp.exp(s)
    p = p * pl.reciprocal(jnp.sum(p, axis=-1, keepdims=True), approx=False)
    o_ref[0] = jnp.dot(p, v, preferred_element_type=jnp.float32).astype(o_ref.dtype)


# -----------------------------------------------------------------------------
# One-time host-side parameter / mask packing (hoisted out of the forward pass)
# -----------------------------------------------------------------------------
def prepare_qkv_params(wq, bq, wk, bk, wv, bv):
    """Call ONCE at parameter-load time, not per forward.

    PyTorch Linear weights are (head_size, n_embed); biases (head_size,).
    Returns:
      w_pad: (E, 3*LANE) fused, transposed, query block pre-scaled by 1/sqrt(head_size),
             each of the q/k/v column blocks zero-padded to 128 lanes.
      b_pad: (1, 3*LANE) matching fused bias.
    """
    H, E = wq.shape
    scale = 1.0 / math.sqrt(H)        # torch SDPA default scale for is_causal=True
    w_pad = jnp.zeros((E, 3 * LANE), jnp.float32)
    w_pad = w_pad.at[:, 0:H].set((wq * scale).T)
    w_pad = w_pad.at[:, LANE:LANE + H].set(wk.T)
    w_pad = w_pad.at[:, 2 * LANE:2 * LANE + H].set(wv.T)
    b_pad = jnp.zeros((1, 3 * LANE), jnp.float32)
    b_pad = b_pad.at[0, 0:H].set(bq * scale)
    b_pad = b_pad.at[0, LANE:LANE + H].set(bk)
    b_pad = b_pad.at[0, 2 * LANE:2 * LANE + H].set(bv)
    return w_pad, b_pad


def make_block_causal_bias(batch, seq_len):
    """(B*T, B*T) additive bias for the collapsed kernel: 0 within the same batch element
    at causal positions, -1e30 everywhere else (finite -> no NaN even for masked rows)."""
    n = batch * seq_len
    row = jnp.arange(n)[:, None]
    col = jnp.arange(n)[None, :]
    allow = ((row // seq_len) == (col // seq_len)) & (col <= row)
    return jnp.where(allow, 0.0, -1e30).astype(jnp.float32)


def make_causal_bias(seq_len):
    """(T, T) additive causal bias for the per-batch (v7x batch-parallel) kernel."""
    row = jnp.arange(seq_len)[:, None]
    col = jnp.arange(seq_len)[None, :]
    return jnp.where(col <= row, 0.0, -1e30).astype(jnp.float32)


# -----------------------------------------------------------------------------
# Wrappers
# -----------------------------------------------------------------------------
def causal_self_attention(x, w_pad, b_pad, attn_bias, head_size):
    """Default path (v5e/v6e, 1 TensorCore): collapsed (B*T, E) problem in a single
    gridless pallas_call with whole-array VMEM blocks. Returns (B, T, head_size)."""
    B, T, E = x.shape
    x2d = x.reshape(B * T, E)
    vmem = pl.BlockSpec(memory_space=pltpu.MemorySpace.VMEM)
    out = pl.pallas_call(
        _fused_causal_attn_kernel,
        out_shape=jax.ShapeDtypeStruct((B * T, LANE), x.dtype),
        in_specs=[vmem, vmem, vmem, vmem],
        out_specs=vmem,
    )(x2d, w_pad, b_pad, attn_bias)
    return out[:, :head_size].reshape(B, T, head_size)


def causal_self_attention_batch_parallel(x, w_pad, b_pad, causal_bias, head_size):
    """v7x path: grid=(B,) marked "parallel" so the batch splits across both TensorCores."""
    B, T, E = x.shape
    out = pl.pallas_call(
        _per_batch_causal_attn_kernel,
        out_shape=jax.ShapeDtypeStruct((B, T, LANE), x.dtype),
        grid=(B,),
        in_specs=[
            pl.BlockSpec((1, T, E), lambda b: (b, 0, 0)),
            pl.BlockSpec((E, 3 * LANE), lambda b: (0, 0)),
            pl.BlockSpec((1, 3 * LANE), lambda b: (0, 0)),
            pl.BlockSpec((T, T), lambda b: (0, 0)),
        ],
        out_specs=pl.BlockSpec((1, T, LANE), lambda b: (b, 0, 0)),
        compiler_params=pltpu.CompilerParams(dimension_semantics=("parallel",)),
    )(x, w_pad, b_pad, causal_bias)
    return out[:, :, :head_size]


# -----------------------------------------------------------------------------
# Pure-JAX reference (mirrors torch scaled_dot_product_attention with is_causal=True)
# -----------------------------------------------------------------------------
def _reference(x, wq, bq, wk, bk, wv, bv):
    q = x @ wq.T + bq
    k = x @ wk.T + bk
    v = x @ wv.T + bv
    H = wq.shape[0]
    T = x.shape[1]
    s = jnp.einsum("btd,bsd->bts", q, k) / math.sqrt(H)
    mask = jnp.tril(jnp.ones((T, T), dtype=bool))
    s = jnp.where(mask[None], s, -jnp.inf)
    p = jax.nn.softmax(s, axis=-1)
    return jnp.einsum("bts,bsd->btd", p, v)


if __name__ == "__main__":
    # Config implied by the module: n_embed=32, head_size=16, block_size>=seq_len, dropout=0.
    B, T, E, H = 2, 8, 32, 16

    key = jax.random.PRNGKey(0)
    kx, kq, kbq, kk, kbk, kv, kbv = jax.random.split(key, 7)

    x = jax.random.normal(kx, (B, T, E), dtype=jnp.float32)

    # Deterministic PyTorch-Linear-style init: U(-1/sqrt(in_features), 1/sqrt(in_features)).
    bound = 1.0 / math.sqrt(E)
    wq = jax.random.uniform(kq, (H, E), jnp.float32, -bound, bound)
    bq = jax.random.uniform(kbq, (H,), jnp.float32, -bound, bound)
    wk = jax.random.uniform(kk, (H, E), jnp.float32, -bound, bound)
    bk = jax.random.uniform(kbk, (H,), jnp.float32, -bound, bound)
    wv = jax.random.uniform(kv, (H, E), jnp.float32, -bound, bound)
    bv = jax.random.uniform(kbv, (H,), jnp.float32, -bound, bound)

    # One-time host-side packing (feedback: hoist weight prep / mask out of the forward).
    w_pad, b_pad = prepare_qkv_params(wq, bq, wk, bk, wv, bv)
    block_bias = make_block_causal_bias(B, T)   # (B*T, B*T) for the collapsed kernel
    causal_bias = make_causal_bias(T)           # (T, T) for the batch-parallel kernel

    ref = _reference(x, wq, bq, wk, bk, wv, bv)

    # Default (collapsed, gridless) path — best for v5e/v6e (single TensorCore).
    out = causal_self_attention(x, w_pad, b_pad, block_bias, H)
    out = jax.block_until_ready(out)
    assert out.shape == (B, T, H)
    assert jnp.allclose(out, ref, atol=1e-5, rtol=1e-5), "collapsed kernel mismatch vs reference"

    # Batch-parallel path — intended for v7x (2 TensorCores); validated here for correctness.
    out_bp = causal_self_attention_batch_parallel(x, w_pad, b_pad, causal_bias, H)
    out_bp = jax.block_until_ready(out_bp)
    assert out_bp.shape == (B, T, H)
    assert jnp.allclose(out_bp, ref, atol=1e-5, rtol=1e-5), "batch-parallel kernel mismatch vs reference"

    print("KERNEL_OK")
</pallas_src>

<mosaic_0001>
module attributes {stable_mosaic.version = 11 : i64} {
  func.func @_fused_causal_attn_kernel(%arg0: memref<16x32xf32, #tpu.memory_space<vmem>>, %arg1: memref<32x384xf32, #tpu.memory_space<vmem>>, %arg2: memref<1x384xf32, #tpu.memory_space<vmem>>, %arg3: memref<16x16xf32, #tpu.memory_space<vmem>>, %arg4: memref<16x128xf32, #tpu.memory_space<vmem>>) attributes {dimension_semantics = [], scalar_prefetch = 0 : i64, scratch_operands = 0 : i64, tpu.core_type = #tpu.core_type<tc>} {
    %c0 = arith.constant 0 : index
    %c0_0 = arith.constant 0 : index
    %0 = vector.load %arg0[%c0, %c0_0] : memref<16x32xf32, #tpu.memory_space<vmem>>, vector<16x32xf32>
    %c0_1 = arith.constant 0 : index
    %c0_2 = arith.constant 0 : index
    %1 = vector.load %arg1[%c0_1, %c0_2] : memref<32x384xf32, #tpu.memory_space<vmem>>, vector<32x384xf32>
    %cst = arith.constant dense<0.000000e+00> : vector<16x384xf32>
    %2 = tpu.matmul %0, %1, %cst {dimension_numbers = #tpu.dot_dimension_numbers<[1], [0], [0], [1], [0, 0, 1, 1], [], []>} : vector<16x32xf32>, vector<32x384xf32>, vector<16x384xf32> -> vector<16x384xf32>
    %c0_3 = arith.constant 0 : index
    %c0_4 = arith.constant 0 : index
    %3 = vector.load %arg2[%c0_3, %c0_4] : memref<1x384xf32, #tpu.memory_space<vmem>>, vector<1x384xf32>
    %4 = vector.broadcast %3 : vector<1x384xf32> to vector<16x384xf32>
    %5 = arith.addf %2, %4 : vector<16x384xf32>
    %6 = vector.extract_strided_slice %5 {offsets = [0, 0], sizes = [16, 128], strides = [1, 1]} : vector<16x384xf32> to vector<16x128xf32>
    %7 = vector.extract_strided_slice %5 {offsets = [0, 128], sizes = [16, 128], strides = [1, 1]} : vector<16x384xf32> to vector<16x128xf32>
    %8 = vector.extract_strided_slice %5 {offsets = [0, 256], sizes = [16, 128], strides = [1, 1]} : vector<16x384xf32> to vector<16x128xf32>
    %cst_5 = arith.constant dense<0.000000e+00> : vector<16x16xf32>
    %9 = tpu.matmul %6, %7, %cst_5 {dimension_numbers = #tpu.dot_dimension_numbers<[1], [1], [0], [0], [0, 0, 1, 0], [], []>} : vector<16x128xf32>, vector<16x128xf32>, vector<16x16xf32> -> vector<16x16xf32>
    %c0_6 = arith.constant 0 : index
    %c0_7 = arith.constant 0 : index
    %10 = vector.load %arg3[%c0_6, %c0_7] : memref<16x16xf32, #tpu.memory_space<vmem>>, vector<16x16xf32>
    %11 = arith.addf %9, %10 : vector<16x16xf32>
    %cst_8 = arith.constant dense<0xFF800000> : vector<16xf32>
    %12 = vector.multi_reduction <maximumf>, %11, %cst_8 [1] : vector<16x16xf32> to vector<16xf32>
    %13 = vector.shape_cast %12 : vector<16xf32> to vector<16x1xf32>
    %14 = vector.broadcast %13 : vector<16x1xf32> to vector<16x16xf32>
    %15 = arith.subf %11, %14 : vector<16x16xf32>
    %16 = math.exp %15 : vector<16x16xf32>
    %cst_9 = arith.constant dense<0.000000e+00> : vector<16xf32>
    %17 = vector.multi_reduction <add>, %16, %cst_9 [1] : vector<16x16xf32> to vector<16xf32>
    %18 = vector.shape_cast %17 : vector<16xf32> to vector<16x1xf32>
    %19 = tpu.reciprocal %18 : vector<16x1xf32> -> vector<16x1xf32>
    %20 = vector.broadcast %19 : vector<16x1xf32> to vector<16x16xf32>
    %21 = arith.mulf %16, %20 : vector<16x16xf32>
    %cst_10 = arith.constant dense<0.000000e+00> : vector<16x128xf32>
    %22 = tpu.matmul %21, %8, %cst_10 {dimension_numbers = #tpu.dot_dimension_numbers<[1], [0], [0], [1], [0, 0, 1, 1], [], []>} : vector<16x16xf32>, vector<16x128xf32>, vector<16x128xf32> -> vector<16x128xf32>
    %c0_11 = arith.constant 0 : index
    %c0_12 = arith.constant 0 : index
    %23 = vector.load %arg4[%c0_11, %c0_12] : memref<16x128xf32, #tpu.memory_space<vmem>>, vector<16x128xf32>
    tpu.vector_store %arg4[%c0_11, %c0_12], %22 {strides = array<i32>} : memref<16x128xf32, #tpu.memory_space<vmem>>, vector<16x128xf32>,
    return
  }
}

</mosaic_0001>

<bundles_post_ra>
// kernel: tpu_custom_call.1
= control target key start
LH: loop header
LB: loop body
LE: loop exit
PB: predicated region body
PF: predicated region fallthrough
CT: control target
= control target key end

     0   :  { %9 = vsyncpa [#allocation3], 0  ;;  %s530_s0 = inlined_call_operand.hbm [shape: f32[16,32], index: 0, kind: input, shape index: {}]   ;;  %s531_s1 = inlined_call_operand.hbm [shape: f32[32,384], index: 1, kind: input, shape index: {}]   ;;  %s532_s2 = inlined_call_operand.hbm [shape: f32[1,384], index: 2, kind: input, shape index: {}]   ;;  %s533_s3 = inlined_call_operand.hbm [shape: f32[16,16], index: 3, kind: input, shape index: {}]   ;;  %s534_s4 = inlined_call_operand.hbm [shape: f32[16,128], index: 4, kind: output, shape index: {}]  }
   0x1   :  { %10 = vsyncpa [#allocation6], 0 }
   0x2   :  { %11 = vsyncpa [#allocation9], 0  ;;  %s30_s17 = sshll.u32 %s531_s1, 4  ;;  %s31_s17 = int_to_ptr.hbm [resolvable:$true] %s30_s17 }
   0x3   :  { %12 = vsyncpa [#allocation4], 0  ;;  %s460_s18 = smov [#allocation5]   ;;  %s17_s22 = sshll.u32 %s530_s0, 4  ;;  %s18_s22 = int_to_ptr.hbm [resolvable:$true] %s17_s22 }
   0x4   :  { %s32_s19 = sshll.u32 %s460_s18, 4  ;;  %s461_s23 = smov 384   ;;  %s33_s19 = int_to_ptr.vmem [resolvable:$true] %s32_s19 }
   0x5   :  { %s462_s24 = smov 24   ;;  %s463_s25 = smov [#allocation2]  }
   0x6   :  { %38 = dma.hbm_to_vmem [thread:$0]  %s31_s17, 1536, %s33_s19, [#allocation6], %s461_s23, %s461_s23, %s462_s24  }
   0x7   :  { %s19_s26 = sshll.u32 %s463_s25, 4  ;;  %s464_s27 = smov 128   ;;  %s20_s26 = int_to_ptr.vmem [resolvable:$true] %s19_s26 }
   0x8   :  { %s465_s28 = smov 8   ;;  %s44_s30 = sshll.u32 %s532_s2, 4  ;;  %s45_s30 = int_to_ptr.hbm [resolvable:$true] %s44_s30 }
   0x9   :  { %25 = dma.hbm_to_vmem [thread:$0]  %s18_s22, 256, %s20_s26, [#allocation3], %s464_s27, %s464_s27, %s465_s28  }
   0xa   :  { %s466_s5 = smov [#allocation7]   ;;  %s54_s8 = sshll.u32 %s533_s3, 4  ;;  %s55_s8 = int_to_ptr.hbm [resolvable:$true] %s54_s8 }
   0xb   :  { %s46_s0 = sshll.u32 %s466_s5, 4  ;;  %s467_s9 = smov [#allocation8]   ;;  %s47_s0 = int_to_ptr.vmem [resolvable:$true] %s46_s0 }
   0xc   :  { %49 = dma.hbm_to_vmem [thread:$0]  %s45_s30, 48, %s47_s0, [#allocation6]  }
   0xd   :  { %s56_s10 = sshll.u32 %s467_s9, 4  ;;  %s57_s10 = int_to_ptr.vmem [resolvable:$true] %s56_s10 }
   0xe   :  { %62 = dma.hbm_to_vmem [thread:$0]  %s55_s8, 256, %s57_s10, [#allocation9], %s464_s27, %s464_s27, %s465_s28  }
   0xf   :  { %452 = dma.done.wait [#allocation3], 256  }
  0x10   :  { %453 = vsyncadd [#allocation3], 4294967040 }
  0x11   :  { %454 = dma.done.wait [#allocation6], 1584  }
  0x12   :  { %455 = vsyncadd [#allocation6], 4294965712 }
  0x13   :  { %456 = dma.done.wait [#allocation9], 256  }
  0x14   :  { %457 = vsyncadd [#allocation9], 4294967040  ;;  %v90_v0 = vld [vmem:[#allocation5 + $0x48] sm:$0xff]  ;;  %v87_v1 = vld [vmem:[#allocation5 + $0x30] sm:$0xff]  ;;  %vm101_vm0 = vcmask 261120   ;;  %vm202_vm1 = vcmask 130048  }
  0x15   :  { %311 = vmatpush.msra.mxu1 %v90_v0  ;;  %120 = vmatpush.msra.mxu0 %v90_v0  ;;  %v84_v2 = vld [vmem:[#allocation5 + $0x18] sm:$0xff]  ;;  %v81_v3 = vld [vmem:[#allocation5] sm:$0xff]  ;;  %v91_v5 = vld [vmem:[#allocation5 + $0x50] sm:$0xff]  ;;  %s468_s2 = smov [#allocation10]   ;;  %s288_s13 = sshll.u32 %s534_s4, 4  ;;  %s289_s13 = int_to_ptr.hbm [resolvable:$true] %s288_s13 }
  0x16   :  { %v80_v4 = vld [vmem:[#allocation2 + $0x8] sm:$0xff]  ;;  %v79_v6 = vld [vmem:[#allocation2] sm:$0xff]  ;;  %v85_v8 = vld [vmem:[#allocation5 + $0x20] sm:$0xff]  ;;  %s286_s3 = sshll.u32 %s468_s2, 4  ;;  %s287_s3 = int_to_ptr.vmem [resolvable:$true] %s286_s3 }
  0x17   :  { %312 = vmatpush.msra.mxu1 %v87_v1  ;;  %121 = vmatpush.msra.mxu0 %v87_v1  ;;  %v88_v7 = vld [vmem:[#allocation5 + $0x38] sm:$0xff]  ;;  %v82_v9 = vld [vmem:[#allocation5 + $0x8] sm:$0xff]  ;;  %v93_v12 = vld [vmem:[#allocation7] sm:$0x7] }
  0x18   :  { %v96_v13 = vperm.slane %v93_v12, 1  ;;  %v95_v17 = vperm.slane %v93_v12, 0  ;;  %v92_v21 = vld [vmem:[#allocation5 + $0x58] sm:$0xff]  ;;  %v89_v22 = vld [vmem:[#allocation5 + $0x40] sm:$0xff]  ;;  %v86_v23 = vld [vmem:[#allocation5 + $0x28] sm:$0xff]  ;;  %v97_v37 = vperm.slane %v93_v12, 2 }
  0x19   :  { %313 = vmatpush.msra.mxu1 %v84_v2  ;;  %122 = vmatpush.msra.mxu0 %v84_v2  ;;  %v83_v24 = vld [vmem:[#allocation5 + $0x10] sm:$0xff]  ;;  %v177_v25 = vld [vmem:[#allocation8] sm:$0xff] }
  0x1a   :  { %166 = vmatpush.msra.mxu2 %v92_v21  ;;  %v178_v29 = vld [vmem:[#allocation8 + $0x8] sm:$0xff] }
  0x1b   :  { %314 = vmatpush.msra.mxu1 %v81_v3  ;;  %123 = vmatpush.msra.mxu0 %v81_v3 }
  0x1c   :  { %304 = vmatmul.msk.f32.vlgmr.msra.gmra.mxu1 %vm101_vm0, %v80_v4  ;;  %303 = vmatmul.msk.f32.vlgmr.msra.gmra.mxu0 %vm101_vm0, %v79_v6 }
  0x1d   :  { %143 = vmatpush.msrb.mxu1 %v91_v5  ;;  %167 = vmatpush.msra.mxu2 %v89_v22 }
  0x1f   :  { %144 = vmatpush.msrb.mxu1 %v88_v7  ;;  %168 = vmatpush.msra.mxu2 %v86_v23 }
  0x21   :  { %145 = vmatpush.msrb.mxu1 %v85_v8  ;;  %169 = vmatpush.msra.mxu2 %v83_v24 }
  0x22   :  { %307 = vmatmul.msk.f32.vlgmr.msra.gmra.mxu2 %vm101_vm0, %v79_v6 }
  0x23   :  { %146 = vmatpush.msrb.mxu1 %v82_v9 }
  0x24   :  { %305 = vmatmul.msk.f32.vlgmr.msrb.gmra.mxu1 %vm101_vm0, %v79_v6 }
  0x2a   :  { %308 = vmatmul.msk.f32.gmra.mxu2 %vm101_vm0, %v80_v4 }
  0x2c   :  { %306 = vmatmul.msk.f32.gmra.mxu1 %vm101_vm0, %v80_v4 }
  0x99   :  { %v128_v10 = vpop.f32.mrf.mxu1  ;;  %v125_v16 = vpop.f32.mrf.mxu0 }
  0x9a   :  { %v126_v19 = vadd.f32 %v125_v16, %v95_v17  ;;  %v129_v20 = vadd.f32 %v128_v10, %v95_v17 }
  0xa1   :  { %v148_v11 = vpop.f32.mrf.mxu1 }
  0xa2   :  { %v149_v18 = vadd.f32 %v148_v11, %v96_v13 }
  0xa5   :  { %v171_v34 = vpop.f32.mrf.mxu2 }
  0xa6   :  { %v172_v41 = vadd.f32 %v171_v34, %v97_v37 }
  0xa9   :  { %v151_v14 = vpop.f32.mrf.mxu1 }
  0xaa   :  { %v152_v15 = vadd.f32 %v151_v14, %v96_v13 }
  0xac   :  { %193 = vmatpush.xpose.msra.mxu3 %v152_v15 }
  0xad   :  { %v174_v39 = vpop.f32.mrf.mxu2 }
  0xae   :  { %v175_v42 = vadd.f32 %v174_v39, %v97_v37 }
  0xb0   :  { %194 = vmatpush.xpose.msra.mxu3 %v149_v18  ;;  %271 = vmatpush.msrb.mxu0 %v175_v42 }
  0xb2   :  { %272 = vmatpush.msrb.mxu0 %v172_v41 }
  0xb3   :  { %195 = vmatmul.f32.vlgmr.msra.gmra.mxu3 %v126_v19 }
  0xbb   :  { %198 = vmatmul.f32.gmra.mxu3 %v129_v20 }
 0x136   :  { %v196_v26 = vpop.f32.mrf.mxu3 }
 0x137   :  { %v197_v27 = vadd.f32 %v196_v26, %v177_v25 }
 0x139   :  { %v203_v28 = vsel %vm202_vm1, %v197_v27, -inf }
 0x13a   :  { %204 = vmax.xlane.f32.xlu0 %v203_v28 }
 0x13e   :  { %v199_v30 = vpop.f32.mrf.mxu3 }
 0x13f   :  { %v200_v31 = vadd.f32 %v199_v30, %v178_v29 }
 0x141   :  { %v206_v32 = vsel %vm202_vm1, %v200_v31, -inf }
 0x142   :  { %207 = vmax.xlane.f32.xlu0 %v206_v32 }
 0x1ad   :  { %v205_v33 = vpop.xlane.xlu0 %204 }
 0x1ae   :  { %v209_v35 = vsub.f32 %v197_v27, %v205_v33 }
 0x1b0   :  { %v211_v36 = vmul.f32 1.442695, %v209_v35 }
 0x1b2   :  { %324 = vpow2.f32 %v211_v36 }
 0x1b5   :  { %v208_v38 = vpop.xlane.xlu0 %207 }
 0x1b6   :  { %v210_v40 = vsub.f32 %v200_v31, %v208_v38 }
 0x1b8   :  { %v325_v43 = vpop.eup %324  ;;  %v213_v44 = vmul.f32 1.442695, %v210_v40 }
 0x1b9   :  { %v215_v45 = vsel %vm202_vm1, %v325_v43, 0.0 }
 0x1ba   :  { %326 = vpow2.f32 %v213_v44  ;;  %216 = vadd.xlane.f32.xlu1 %v215_v45 }
 0x1c0   :  { %v327_v46 = vpop.eup %326 }
 0x1c1   :  { %v218_v47 = vsel %vm202_vm1, %v327_v46, 0.0 }
 0x1c2   :  { %219 = vadd.xlane.f32.xlu1 %v218_v47 }
 0x22d   :  { %v217_v48 = vpop.xlane.xlu1 %216 }
 0x22e   :  { %328 = vrcp.f32 %v217_v48  ;;  %v232_v53 = vand.u32 2147483648, %v217_v48  ;;  %v230_v55 = vand.u32 2147483647, %v217_v48  ;;  %vm226_vm3 = vweird.f32 %v217_v48 }
 0x230   :  { %v233_v58 = vor.u32 1.1754944e-38, %v232_v53  ;;  %vm231_vm5 = vcmp.eq.f32.partialorder %v230_v55, 8.507059e+37 }
 0x234   :  { %v329_v49 = vpop.eup %328 }
 0x235   :  { %v222_v50 = vmul.f32 %v329_v49, %v217_v48  ;;  %v220_v51 = vpop.xlane.xlu1 %219  ;;  %vm227_vm2 = vweird.f32 %v329_v49 }
 0x236   :  { %330 = vrcp.f32 %v220_v51  ;;  %vm228_vm4 = vmor %vm226_vm3, %vm227_vm2  ;;  %v246_v0 = vand.u32 2147483648, %v220_v51  ;;  %v244_v2 = vand.u32 2147483647, %v220_v51  ;;  %vm240_vm7 = vweird.f32 %v220_v51 }
 0x237   :  { %v223_v52 = vsub.f32 1.0, %v222_v50 }
 0x238   :  { %v247_v4 = vor.u32 1.1754944e-38, %v246_v0  ;;  %vm245_vm9 = vcmp.eq.f32.partialorder %v244_v2, 8.507059e+37 }
 0x239   :  { %v224_v54 = vmul.f32 %v329_v49, %v223_v52 }
 0x23b   :  { %v225_v56 = vadd.f32 %v329_v49, %v224_v54 }
 0x23c   :  { %v331_v57 = vpop.eup %330 }
 0x23d   :  { %v236_v59 = vmul.f32 %v331_v57, %v220_v51  ;;  %v229_v60 = vsel %vm228_vm4, %v329_v49, %v225_v56  ;;  %vm241_vm6 = vweird.f32 %v331_v57 }
 0x23e   :  { %v234_v61 = vsel %vm231_vm5, %v233_v58, %v229_v60  ;;  %vm242_vm8 = vmor %vm240_vm7, %vm241_vm6 }
 0x23f   :  { %v237_v62 = vsub.f32 1.0, %v236_v59  ;;  %v249_v63 = vmul.f32 %v325_v43, %v234_v61 }
 0x241   :  { %v238_v1 = vmul.f32 %v331_v57, %v237_v62  ;;  %309 = vmatmul.msk.f32.vlgmr.msrb.gmra.mxu0 %vm202_vm1, %v249_v63 }
 0x243   :  { %v239_v3 = vadd.f32 %v331_v57, %v238_v1 }
 0x245   :  { %v243_v5 = vsel %vm242_vm8, %v331_v57, %v239_v3 }
 0x246   :  { %v248_v6 = vsel %vm245_vm9, %v247_v4, %v243_v5 }
 0x247   :  { %v250_v7 = vmul.f32 %v327_v46, %v248_v6 }
 0x249   :  { %310 = vmatmul.msk.f32.gmra.mxu0 %vm202_vm1, %v250_v7 }
 0x2be   :  { %v274_v8 = vpop.f32.mrf.mxu0 }
 0x2bf   :  { %280 = vst [vmem:[#allocation10] sm:$0xff] %v274_v8 }
 0x2c6   :  { %v277_v9 = vpop.f32.mrf.mxu0 }
 0x2c7   :  { %281 = vst [vmem:[#allocation10 + $0x8] sm:$0xff] %v277_v9 }
 0x2c8   :  { %294 = dma.vmem_to_hbm [thread:$0]  %s287_s3, 256, %s289_s13, [#allocation4], %s464_s27, %s464_s27, %s465_s28  }
 0x2c9   :  { %458 = dma.done.wait [#allocation4], 256  }
 0x2ca   :  { %459 = vsyncadd [#allocation4], 4294967040 }
 0x2cb   :  { %299 = vsyncpa [#allocation3], 1 }
 0x2cc   :  { %300 = vsyncpa [#allocation6], 1 }
 0x2cd   :  { %301 = vsyncpa [#allocation9], 1 }
 0x2ce   :  { %302 = vsyncpa [#allocation4], 1 }

</bundles_post_ra>
